<compile_context>
chip_gen: v6e
topology: v6e:2x2x1
jax: 0.10.0
libtpu: 0.0.40
codegen_flags: <defaults>
</compile_context>

<pallas_src>
import functools

import jax
import jax.numpy as jnp
import numpy as np
from jax.experimental import pallas as pl
from jax.experimental.pallas import tpu as pltpu


def _round_up(x, m):
    return (x + m - 1) // m * m


def _vmem_limit_bytes():
    """~3/4 of physical VMEM: ~96 MiB on v5e/v6e (128 MiB), ~48 MiB on v7x (64 MiB)."""
    cap = None
    try:
        cap = int(pltpu.get_tpu_info().vmem_capacity_bytes)
    except Exception:
        cap = None
    if not cap or cap <= 0:
        cap = 64 * 1024 * 1024  # conservative fallback (v7x per-core size)
    return min(cap * 3 // 4, 100 * 1024 * 1024)


def _gate_dtype():
    """bf16 tanh/sigmoid only on generations with a bf16 VPU/EUP (v6e / v7x)."""
    try:
        kind = jax.devices()[0].device_kind.lower()
    except Exception:
        return jnp.float32
    return jnp.bfloat16 if ("v6" in kind or "v7" in kind) else jnp.float32


def _estimate_vmem_bytes(T_tile, C_in_p, C_out_p, K, halo_rows):
    """Rough per-grid-step VMEM footprint: double-buffered I/O + weights + temps."""
    bf16, f32 = 2, 4
    io = 2 * (T_tile * C_in_p + halo_rows * C_in_p + T_tile * 2 * C_in_p) * bf16
    weights = 2 * (K * C_in_p * 2 * C_out_p + C_out_p * 2 * C_in_p) * bf16
    temps = T_tile * (2 * C_out_p * f32 + C_out_p * f32 + 2 * C_in_p * f32 + C_in_p * bf16)
    return io + weights + temps


def _residual_block_kernel(x_ref, halo_ref, wcg_ref, bcg_ref, wrs_ref, brs_ref,
                           out_ref, *, T_tile, K, dilation, pad, pad_r,
                           C_in_p, C_out_p, gate_dtype):
    cur = x_ref[0]                                    # (T_tile, C_in_p) bf16

    if pad > 0:
        # Halo = last pad_r rows of the previous time tile (zeros for tile 0):
        # the zeroed halo IS the causal left zero-padding at sequence start.
        window = jnp.concatenate([halo_ref[0, 0], cur], axis=0)  # (pad_r + T_tile, C_in_p)
        off = pad_r - pad
    else:
        window = cur
        off = 0

    # Fused causal|gate dilated conv: K accumulating bf16 dots, f32 accumulation.
    acc = None
    for k in range(K):
        start = off + k * dilation                    # static Python int
        tap = window[start:start + T_tile, :]
        d = jnp.dot(tap, wcg_ref[k], preferred_element_type=jnp.float32)
        acc = d if acc is None else acc + d
    acc = acc + bcg_ref[...]

    # Gating nonlinearities (bf16 on v6e/v7x, f32 on v5e and older).
    g = acc.astype(gate_dtype)
    gated = jnp.tanh(g[:, :C_out_p]) * jax.nn.sigmoid(g[:, C_out_p:])

    # Fused residual|skip 1x1 conv: single bf16 matmul, f32 accumulation.
    out2 = jnp.dot(gated.astype(jnp.bfloat16), wrs_ref[...],
                   preferred_element_type=jnp.float32)
    out2 = out2 + brs_ref[...]

    # Fused bf16 writeback: lanes [0,C_in_p) = residual, [C_in_p,2*C_in_p) = skip.
    out_ref[0, :, :C_in_p] = (out2[:, :C_in_p]
                              + cur.astype(jnp.float32)).astype(out_ref.dtype)
    out_ref[0, :, C_in_p:] = out2[:, C_in_p:].astype(out_ref.dtype)


def residual_block_pallas(x_nct, params, *, kernel_size, dilation, t_tile=2048):
    """x_nct: (N, C_in, T) float32, PyTorch layout.  Returns (residual, skip) in NCT."""
    N, C_in, T = x_nct.shape
    K = kernel_size
    pad = (K - 1) * dilation
    C_out = params["w_causal"].shape[0]

    LANE, SUB = 128, 16                         # lane width / bf16 sublane pack
    C_in_p = _round_up(C_in, LANE)
    C_out_p = _round_up(C_out, LANE)
    pad_r = _round_up(pad, SUB) if pad > 0 else 0
    halo_rows = pad_r if pad > 0 else SUB       # dummy (ignored) halo when pad == 0

    # Generation-aware tile sizing: start big, shrink until it fits the VMEM budget.
    vmem_limit = _vmem_limit_bytes()
    budget = int(vmem_limit * 0.7)
    min_tile = _round_up(max(pad_r, SUB), SUB)  # halo construction needs T_tile >= pad_r
    T_tile = _round_up(max(min(t_tile, _round_up(T, SUB)), min_tile), SUB)
    while (T_tile > min_tile and
           _estimate_vmem_bytes(T_tile, C_in_p, C_out_p, K, halo_rows) > budget):
        T_tile = max(min_tile, _round_up(T_tile // 2, SUB))
    T_p = _round_up(T, T_tile)
    nT = T_p // T_tile

    # ---- boundary glue (plain JAX): NCT -> NTC, pad channels/time, cast bf16 ----
    x_ntc = jnp.transpose(x_nct, (0, 2, 1))
    x_p = jnp.pad(x_ntc, ((0, 0), (0, T_p - T), (0, C_in_p - C_in))).astype(jnp.bfloat16)

    # Halo slabs: last pad_r rows of each tile, shifted by one tile (zeros for tile 0).
    if pad > 0:
        tails = x_p.reshape(N, nT, T_tile, C_in_p)[:, :, T_tile - pad_r:, :]
        x_halo = jnp.concatenate(
            [jnp.zeros((N, 1, pad_r, C_in_p), jnp.bfloat16), tails[:, :nT - 1]], axis=1)
    else:
        x_halo = jnp.zeros((N, nT, halo_rows, C_in_p), jnp.bfloat16)

    def conv_w(w):                              # (C_out, C_in, K) -> (K, C_in_p, C_out_p)
        w = jnp.transpose(w, (2, 1, 0))
        return jnp.pad(w, ((0, 0), (0, C_in_p - C_in), (0, C_out_p - C_out)))

    # causal | gate fused on the output-channel axis; K kept as a leading axis
    # (one accumulating dot per tap in the kernel).
    wcg = jnp.concatenate([conv_w(params["w_causal"]), conv_w(params["w_gate"])],
                          axis=-1).astype(jnp.bfloat16)           # (K, C_in_p, 2*C_out_p)
    bcg = jnp.concatenate([jnp.pad(params["b_causal"], (0, C_out_p - C_out)),
                           jnp.pad(params["b_gate"], (0, C_out_p - C_out))]
                          ).reshape(1, 2 * C_out_p).astype(jnp.float32)

    def pw_w(w):                                # (C_in, C_out, 1) -> (C_out_p, C_in_p)
        w = jnp.transpose(w[:, :, 0], (1, 0))
        return jnp.pad(w, ((0, C_out_p - C_out), (0, C_in_p - C_in)))

    # residual | skip fused on the output-channel axis.
    wrs = jnp.concatenate([pw_w(params["w_res"]), pw_w(params["w_skip"])],
                          axis=-1).astype(jnp.bfloat16)           # (C_out_p, 2*C_in_p)
    brs = jnp.concatenate([jnp.pad(params["b_res"], (0, C_in_p - C_in)),
                           jnp.pad(params["b_skip"], (0, C_in_p - C_in))]
                          ).reshape(1, 2 * C_in_p).astype(jnp.float32)

    kernel = functools.partial(_residual_block_kernel,
                               T_tile=T_tile, K=K, dilation=dilation, pad=pad,
                               pad_r=pad_r, C_in_p=C_in_p, C_out_p=C_out_p,
                               gate_dtype=_gate_dtype())

    full = lambda shape: pl.BlockSpec(shape, lambda n, t: (0,) * len(shape))

    out = pl.pallas_call(
        kernel,
        out_shape=jax.ShapeDtypeStruct((N, T_p, 2 * C_in_p), jnp.bfloat16),
        grid_spec=pltpu.PrefetchScalarGridSpec(
            num_scalar_prefetch=0,
            grid=(N, nT),
            in_specs=[
                pl.BlockSpec((1, T_tile, C_in_p), lambda n, t: (n, t, 0)),        # x tile
                pl.BlockSpec((1, 1, halo_rows, C_in_p), lambda n, t: (n, t, 0, 0)),  # halo
                full((K, C_in_p, 2 * C_out_p)),                                   # fused conv W
                full((1, 2 * C_out_p)),                                           # fused conv b
                full((C_out_p, 2 * C_in_p)),                                      # fused 1x1 W
                full((1, 2 * C_in_p)),                                            # fused 1x1 b
            ],
            out_specs=pl.BlockSpec((1, T_tile, 2 * C_in_p), lambda n, t: (n, t, 0)),
        ),
        compiler_params=pltpu.CompilerParams(
            dimension_semantics=("parallel", "parallel"),
            vmem_limit_bytes=vmem_limit),
    )(x_p, x_halo, wcg, bcg, wrs, brs)

    res = jnp.transpose(out[:, :T, :C_in], (0, 2, 1)).astype(x_nct.dtype)
    skip = jnp.transpose(out[:, :T, C_in_p:C_in_p + C_in], (0, 2, 1)).astype(x_nct.dtype)
    return res, skip


# ---------------- pure-JAX reference (mirrors the PyTorch module) ----------------
def _ref_forward(x_nct, params, *, kernel_size, dilation):
    pad = (kernel_size - 1) * dilation

    def conv1d(x, w, b, dil, p):
        y = jax.lax.conv_general_dilated(
            x, w, window_strides=(1,), padding=[(p, p)],
            rhs_dilation=(dil,), dimension_numbers=("NCH", "OIH", "NCH"))
        return y + b[None, :, None]

    tanh_out = jnp.tanh(conv1d(x_nct, params["w_causal"], params["b_causal"],
                               dilation, pad)[:, :, :-pad])
    sigm_out = jax.nn.sigmoid(conv1d(x_nct, params["w_gate"], params["b_gate"],
                                     dilation, pad)[:, :, :-pad])
    gated = tanh_out * sigm_out
    res = conv1d(gated, params["w_res"], params["b_res"], 1, 0)
    skp = conv1d(gated, params["w_skip"], params["b_skip"], 1, 0)
    return res + x_nct, skp


if __name__ == "__main__":
    N, C_in, C_out, T = 2, 4, 8, 16
    kernel_size, dilation = 3, 2

    key = jax.random.PRNGKey(0)
    ks = jax.random.split(key, 9)
    scale = 0.1
    params = {
        "w_causal": scale * jax.random.normal(ks[0], (C_out, C_in, kernel_size), jnp.float32),
        "b_causal": scale * jax.random.normal(ks[1], (C_out,), jnp.float32),
        "w_gate":   scale * jax.random.normal(ks[2], (C_out, C_in, kernel_size), jnp.float32),
        "b_gate":   scale * jax.random.normal(ks[3], (C_out,), jnp.float32),
        "w_res":    scale * jax.random.normal(ks[4], (C_in, C_out, 1), jnp.float32),
        "b_res":    scale * jax.random.normal(ks[5], (C_in,), jnp.float32),
        "w_skip":   scale * jax.random.normal(ks[6], (C_in, C_out, 1), jnp.float32),
        "b_skip":   scale * jax.random.normal(ks[7], (C_in,), jnp.float32),
    }
    x = jax.random.normal(ks[8], (N, C_in, T), jnp.float32)

    res, skip = residual_block_pallas(x, params, kernel_size=kernel_size, dilation=dilation)
    jax.block_until_ready((res, skip))

    res_ref, skip_ref = _ref_forward(x, params, kernel_size=kernel_size, dilation=dilation)
    # bf16 matmul operands / bf16 outputs (f32 accumulation) -> looser tolerance than pure f32.
    np.testing.assert_allclose(np.asarray(res), np.asarray(res_ref), rtol=2e-2, atol=2e-2)
    np.testing.assert_allclose(np.asarray(skip), np.asarray(skip_ref), rtol=2e-2, atol=2e-2)

    print("KERNEL_OK")
</pallas_src>

<mosaic_0001>
module attributes {stable_mosaic.version = 11 : i64} {
  func.func @_residual_block_kernel(%arg0: i32, %arg1: i32, %arg2: memref<1x16x128xbf16, #tpu.memory_space<vmem>>, %arg3: memref<1x1x16x128xbf16, #tpu.memory_space<vmem>>, %arg4: memref<3x128x256xbf16, #tpu.memory_space<vmem>>, %arg5: memref<1x256xf32, #tpu.memory_space<vmem>>, %arg6: memref<128x256xbf16, #tpu.memory_space<vmem>>, %arg7: memref<1x256xf32, #tpu.memory_space<vmem>>, %arg8: memref<1x16x256xbf16, #tpu.memory_space<vmem>>) attributes {dimension_semantics = [#tpu.dimension_semantics<parallel>, #tpu.dimension_semantics<parallel>], iteration_bounds = array<i64: 2, 1>, scalar_prefetch = 0 : i64, scratch_operands = 0 : i64, tpu.core_type = #tpu.core_type<tc>, window_params = [{transform_indices = @transform_0, window_bounds = array<i64: 1, 16, 128>}, {transform_indices = @transform_1, window_bounds = array<i64: 1, 1, 16, 128>}, {pipeline_mode = #tpu.pipeline_mode<synchronous>, transform_indices = @transform_2, window_bounds = array<i64: 3, 128, 256>}, {pipeline_mode = #tpu.pipeline_mode<synchronous>, transform_indices = @transform_3, window_bounds = array<i64: 1, 256>}, {pipeline_mode = #tpu.pipeline_mode<synchronous>, transform_indices = @transform_4, window_bounds = array<i64: 128, 256>}, {pipeline_mode = #tpu.pipeline_mode<synchronous>, transform_indices = @transform_5, window_bounds = array<i64: 1, 256>}, {transform_indices = @transform_6, window_bounds = array<i64: 1, 16, 256>}]} {
    %c0 = arith.constant 0 : index
    %c0_0 = arith.constant 0 : index
    %c0_1 = arith.constant 0 : index
    %0 = vector.load %arg2[%c0, %c0_0, %c0_1] : memref<1x16x128xbf16, #tpu.memory_space<vmem>>, vector<1x16x128xbf16>
    %1 = vector.shape_cast %0 : vector<1x16x128xbf16> to vector<16x128xbf16>
    %c0_2 = arith.constant 0 : index
    %c0_3 = arith.constant 0 : index
    %c0_4 = arith.constant 0 : index
    %c0_5 = arith.constant 0 : index
    %2 = vector.load %arg3[%c0_2, %c0_3, %c0_4, %c0_5] : memref<1x1x16x128xbf16, #tpu.memory_space<vmem>>, vector<1x1x16x128xbf16>
    %3 = vector.shape_cast %2 : vector<1x1x16x128xbf16> to vector<16x128xbf16>
    %4 = tpu.concatenate %3, %1 in 0 : vector<16x128xbf16>, vector<16x128xbf16> -> vector<32x128xbf16>
    %5 = vector.extract_strided_slice %4 {offsets = [12, 0], sizes = [16, 128], strides = [1, 1]} : vector<32x128xbf16> to vector<16x128xbf16>
    %c0_6 = arith.constant 0 : index
    %c0_7 = arith.constant 0 : index
    %c0_8 = arith.constant 0 : index
    %6 = vector.load %arg4[%c0_6, %c0_7, %c0_8] : memref<3x128x256xbf16, #tpu.memory_space<vmem>>, vector<1x128x256xbf16>
    %7 = vector.shape_cast %6 : vector<1x128x256xbf16> to vector<128x256xbf16>
    %cst = arith.constant dense<0.000000e+00> : vector<16x256xf32>
    %8 = tpu.matmul %5, %7, %cst {dimension_numbers = #tpu.dot_dimension_numbers<[1], [0], [0], [1], [0, 0, 1, 1], [], []>} : vector<16x128xbf16>, vector<128x256xbf16>, vector<16x256xf32> -> vector<16x256xf32>
    %9 = vector.extract_strided_slice %4 {offsets = [14, 0], sizes = [16, 128], strides = [1, 1]} : vector<32x128xbf16> to vector<16x128xbf16>
    %c1 = arith.constant 1 : index
    %c0_9 = arith.constant 0 : index
    %c0_10 = arith.constant 0 : index
    %10 = vector.load %arg4[%c1, %c0_9, %c0_10] : memref<3x128x256xbf16, #tpu.memory_space<vmem>>, vector<1x128x256xbf16>
    %11 = vector.shape_cast %10 : vector<1x128x256xbf16> to vector<128x256xbf16>
    %cst_11 = arith.constant dense<0.000000e+00> : vector<16x256xf32>
    %12 = tpu.matmul %9, %11, %cst_11 {dimension_numbers = #tpu.dot_dimension_numbers<[1], [0], [0], [1], [0, 0, 1, 1], [], []>} : vector<16x128xbf16>, vector<128x256xbf16>, vector<16x256xf32> -> vector<16x256xf32>
    %13 = arith.addf %8, %12 : vector<16x256xf32>
    %14 = vector.extract_strided_slice %4 {offsets = [16, 0], sizes = [16, 128], strides = [1, 1]} : vector<32x128xbf16> to vector<16x128xbf16>
    %c2 = arith.constant 2 : index
    %c0_12 = arith.constant 0 : index
    %c0_13 = arith.constant 0 : index
    %15 = vector.load %arg4[%c2, %c0_12, %c0_13] : memref<3x128x256xbf16, #tpu.memory_space<vmem>>, vector<1x128x256xbf16>
    %16 = vector.shape_cast %15 : vector<1x128x256xbf16> to vector<128x256xbf16>
    %cst_14 = arith.constant dense<0.000000e+00> : vector<16x256xf32>
    %17 = tpu.matmul %14, %16, %cst_14 {dimension_numbers = #tpu.dot_dimension_numbers<[1], [0], [0], [1], [0, 0, 1, 1], [], []>} : vector<16x128xbf16>, vector<128x256xbf16>, vector<16x256xf32> -> vector<16x256xf32>
    %18 = arith.addf %13, %17 : vector<16x256xf32>
    %c0_15 = arith.constant 0 : index
    %c0_16 = arith.constant 0 : index
    %19 = vector.load %arg5[%c0_15, %c0_16] : memref<1x256xf32, #tpu.memory_space<vmem>>, vector<1x256xf32>
    %20 = vector.broadcast %19 : vector<1x256xf32> to vector<16x256xf32>
    %21 = arith.addf %18, %20 : vector<16x256xf32>
    %22 = vector.extract_strided_slice %21 {offsets = [0, 0], sizes = [16, 128], strides = [1, 1]} : vector<16x256xf32> to vector<16x128xf32>
    %23 = math.tanh %22 : vector<16x128xf32>
    %24 = vector.extract_strided_slice %21 {offsets = [0, 128], sizes = [16, 128], strides = [1, 1]} : vector<16x256xf32> to vector<16x128xf32>
    %25 = arith.negf %24 : vector<16x128xf32>
    %26 = math.exp %25 : vector<16x128xf32>
    %cst_17 = arith.constant 1.000000e+00 : f32
    %27 = vector.broadcast %cst_17 : f32 to vector<16x128xf32>
    %28 = arith.addf %27, %26 : vector<16x128xf32>
    %29 = arith.divf %27, %28 : vector<16x128xf32>
    %30 = arith.mulf %23, %29 : vector<16x128xf32>
    %31 = arith.truncf %30 : vector<16x128xf32> to vector<16x128xbf16>
    %c0_18 = arith.constant 0 : index
    %c0_19 = arith.constant 0 : index
    %32 = vector.load %arg6[%c0_18, %c0_19] : memref<128x256xbf16, #tpu.memory_space<vmem>>, vector<128x256xbf16>
    %cst_20 = arith.constant dense<0.000000e+00> : vector<16x256xf32>
    %33 = tpu.matmul %31, %32, %cst_20 {dimension_numbers = #tpu.dot_dimension_numbers<[1], [0], [0], [1], [0, 0, 1, 1], [], []>} : vector<16x128xbf16>, vector<128x256xbf16>, vector<16x256xf32> -> vector<16x256xf32>
    %c0_21 = arith.constant 0 : index
    %c0_22 = arith.constant 0 : index
    %34 = vector.load %arg7[%c0_21, %c0_22] : memref<1x256xf32, #tpu.memory_space<vmem>>, vector<1x256xf32>
    %35 = vector.broadcast %34 : vector<1x256xf32> to vector<16x256xf32>
    %36 = arith.addf %33, %35 : vector<16x256xf32>
    %37 = vector.extract_strided_slice %36 {offsets = [0, 0], sizes = [16, 128], strides = [1, 1]} : vector<16x256xf32> to vector<16x128xf32>
    %38 = arith.extf %1 : vector<16x128xbf16> to vector<16x128xf32>
    %39 = arith.addf %37, %38 : vector<16x128xf32>
    %40 = arith.truncf %39 : vector<16x128xf32> to vector<16x128xbf16>
    %c0_23 = arith.constant 0 : index
    %c0_24 = arith.constant 0 : index
    %c0_25 = arith.constant 0 : index
    %41 = vector.load %arg8[%c0_23, %c0_24, %c0_25] : memref<1x16x256xbf16, #tpu.memory_space<vmem>>, vector<1x16x128xbf16>
    %42 = vector.shape_cast %41 : vector<1x16x128xbf16> to vector<16x128xbf16>
    %43 = vector.shape_cast %40 : vector<16x128xbf16> to vector<1x16x128xbf16>
    tpu.vector_store %arg8[%c0_23, %c0_24, %c0_25], %43 {strides = array<i32>} : memref<1x16x256xbf16, #tpu.memory_space<vmem>>, vector<1x16x128xbf16>,
    %44 = vector.extract_strided_slice %36 {offsets = [0, 128], sizes = [16, 128], strides = [1, 1]} : vector<16x256xf32> to vector<16x128xf32>
    %45 = arith.truncf %44 : vector<16x128xf32> to vector<16x128xbf16>
    %c0_26 = arith.constant 0 : index
    %c0_27 = arith.constant 0 : index
    %c128 = arith.constant 128 : index
    %46 = vector.load %arg8[%c0_26, %c0_27, %c128] : memref<1x16x256xbf16, #tpu.memory_space<vmem>>, vector<1x16x128xbf16>
    %47 = vector.shape_cast %46 : vector<1x16x128xbf16> to vector<16x128xbf16>
    %48 = vector.shape_cast %45 : vector<16x128xbf16> to vector<1x16x128xbf16>
    tpu.vector_store %arg8[%c0_26, %c0_27, %c128], %48 {strides = array<i32>} : memref<1x16x256xbf16, #tpu.memory_space<vmem>>, vector<1x16x128xbf16>,
    return
  }
  func.func @transform_0(%arg0: i32, %arg1: i32) -> (i32, i32, i32) {
    %c0_i32 = arith.constant 0 : i32
    %c0_i32_0 = arith.constant 0 : i32
    return %arg0, %arg1, %c0_i32 : i32, i32, i32
  }
  func.func @transform_1(%arg0: i32, %arg1: i32) -> (i32, i32, i32, i32) {
    %c0_i32 = arith.constant 0 : i32
    %c0_i32_0 = arith.constant 0 : i32
    %c0_i32_1 = arith.constant 0 : i32
    return %arg0, %arg1, %c0_i32, %c0_i32_0 : i32, i32, i32, i32
  }
  func.func @transform_2(%arg0: i32, %arg1: i32) -> (i32, i32, i32) {
    %c0_i32 = arith.constant 0 : i32
    %c0_i32_0 = arith.constant 0 : i32
    %c0_i32_1 = arith.constant 0 : i32
    %c0_i32_2 = arith.constant 0 : i32
    return %c0_i32, %c0_i32_0, %c0_i32_1 : i32, i32, i32
  }
  func.func @transform_3(%arg0: i32, %arg1: i32) -> (i32, i32) {
    %c0_i32 = arith.constant 0 : i32
    %c0_i32_0 = arith.constant 0 : i32
    %c0_i32_1 = arith.constant 0 : i32
    return %c0_i32, %c0_i32_0 : i32, i32
  }
  func.func @transform_4(%arg0: i32, %arg1: i32) -> (i32, i32) {
    %c0_i32 = arith.constant 0 : i32
    %c0_i32_0 = arith.constant 0 : i32
    %c0_i32_1 = arith.constant 0 : i32
    return %c0_i32, %c0_i32_0 : i32, i32
  }
  func.func @transform_5(%arg0: i32, %arg1: i32) -> (i32, i32) {
    %c0_i32 = arith.constant 0 : i32
    %c0_i32_0 = arith.constant 0 : i32
    %c0_i32_1 = arith.constant 0 : i32
    return %c0_i32, %c0_i32_0 : i32, i32
  }
  func.func @transform_6(%arg0: i32, %arg1: i32) -> (i32, i32, i32) {
    %c0_i32 = arith.constant 0 : i32
    %c0_i32_0 = arith.constant 0 : i32
    return %arg0, %arg1, %c0_i32 : i32, i32, i32
  }
}

</mosaic_0001>

<bundles_post_ra>
// kernel: tpu_custom_call.1
= control target key start
LH: loop header
LB: loop body
LE: loop exit
PB: predicated region body
PF: predicated region fallthrough
CT: control target
= control target key end

     0   :  { %s1974_s0 = inlined_call_operand.hbm [shape: bf16[2,16,128], index: 0, kind: input, shape index: {}]   ;;  %s1975_s1 = inlined_call_operand.hbm [shape: bf16[2,1,16,128], index: 1, kind: input, shape index: {}]   ;;  %s1976_s2 = inlined_call_operand.hbm [shape: bf16[3,128,256], index: 2, kind: input, shape index: {}]   ;;  %s1977_s3 = inlined_call_operand.vmem [shape: f32[1,256], index: 3, kind: input, shape index: {}]   ;;  %s1978_s4 = inlined_call_operand.hbm [shape: bf16[128,256], index: 4, kind: input, shape index: {}]   ;;  %s1979_s5 = inlined_call_operand.vmem [shape: f32[1,256], index: 5, kind: input, shape index: {}]   ;;  %s1980_s6 = inlined_call_operand.hbm [shape: bf16[2,16,256], index: 6, kind: output, shape index: {}]  }
   0x1   :  { %1986 = sst [smem:[#allocation20_spill]] %s1974_s0 }
   0x2   :  { %1987 = sst [smem:[#allocation21_spill]] %s1976_s2 }
   0x3   :  { %1988 = sst [smem:[#allocation22_spill]] %s1978_s4 }
   0x4   :  { %11 = vsyncpa [#allocation3], 0 }
   0x5   :  { %13 = vsyncpa [#allocation3 + $0x1], 0 }
   0x6   :  { %14 = vsyncpa [#allocation6], 0 }
   0x7   :  { %16 = vsyncpa [#allocation6 + $0x1], 0 }
   0x8   :  { %17 = vsyncpa [#allocation9], 0 }
   0x9   :  { %18 = vsyncpa [#allocation4], 0 }
   0xa   :  { %20 = vsyncpa [#allocation4 + $0x1], 0  ;;  %s1737_s21 = smov 0   ;;  %s1739_s22 = smov 0  }
   0xb   :  { %s1741_s23 = smov 0   ;;  %s1743_s24 = smov 0  }
   0xc   :  { %s1745_s25 = smov 0   ;;  %s1747_s26 = smov 0  }
   0xd LB: > { %1989 = sst [smem:[#allocation16_spill]] %s1676_s23  ;;  %s1768_s27 = sadd.s32 4294967295, %s1688_s26   ;;  %s1688_s26 = sphi %s1747_s26, %s26_s26   ;;  %s1684_s25 = sphi %s1745_s25, %s2017_s25   ;;  %s1680_s24 = sphi %s1743_s24, %s2016_s24   ;;  %s1676_s23 = sphi %s1741_s23, %s2012_s23   ;;  %s1672_s22 = sphi %s1739_s22, %s2015_s22   ;;  %s1668_s21 = sphi %s1737_s21, %s2014_s21  }
   0xe   : > { %s1170_s28 = sadd.s32 4294967294, %s1688_s26   ;;  %p60_p0 = scmp.ne.s32.totalorder %s1672_s22, %s1668_s21 }
   0xf   : > { %p1981_p1 = scmp.eq.s32.totalorder %s1768_s27, 0  ;;  %p204_p3 = scmp.eq.s32.totalorder %s1170_s28, 1 }
  0x10   : > { %p1171_p5 = scmp.ge.s32.totalorder %s1688_s26, 1  ;;  %p211_p7 = scmp.lt.s32.totalorder %s1688_s26, 3 }
  0x11   : > { %p1777_p4 = por %p1981_p1, %p60_p0  ;;  %p1782_p6 = por %p204_p3, %p60_p0 }
  0x12   : > { %p1787_p8 = pnand %p1171_p5, %p211_p7  ;;  %s1690_s8 = smov [#allocation7]  }
  0x13   : > { %s1991_s30 = scalar_select %p1782_p6, 1, 0 }
  0x14   : > { %s223_s9 = sshll.u32 %s1690_s8, 4  ;;  %p1296_p9 = pneg %p1787_p8  ;;  %s224_s9 = int_to_ptr.vmem [resolvable:$true] %s223_s9 }
  0x15   : > { %1992 = sst [smem:[#allocation17_spill]] %s1991_s30  ;;  %s1691_s11 = smov [#allocation8]  }
  0x16   : > { %p1796_p11 = pnand %p1296_p9, %p1981_p1  ;;  %s239_s12 = sshll.u32 %s1691_s11, 4  ;;  %s240_s12 = int_to_ptr.vmem [resolvable:$true] %s239_s12 }
  0x17   : > { %s1499_s13 = scalar_lea.vmem %s224_s9, 6144  ;;  %p1507_p5 = scmp.lt.s32.totalorder %s224_s9, %s224_s9 }
  0x18   : > { %p1490_p12 = pneg %p1796_p11  ;;  %p1500_p13 = scmp.ne.s32.totalorder %s224_s9, %s1499_s13 }
  0x19   : > { %p1508_p7 = scmp.lt.s32.totalorder %s1499_s13, %s1499_s13 }
  0x1a   : > { %p1502_p0 = pnand %p1500_p13, %p1490_p12 }
  0x1b   : > { %p1509_p10 = por %p1508_p7, %p1507_p5 }
  0x1c   : > { %p1503_p3 = pneg %p1502_p0 }
  0x1e   : > { %p1510_p9 = pnand %p1509_p10, %p1503_p3 }
  0x20   : > { %1513 = shalt.err (!%p1510_p9)
}
  0x21   : > { %s1692_s14 = smov 128   ;;  %s1693_s15 = smov 8  }
  0x22   : > { %s1995_s2 = sld [smem:[#allocation21_spill]]  ;;  %s1525_s18 = scalar_lea.vmem %s240_s12, 2048 }
  0x23   : > { %p1526_p1 = scmp.ne.s32.totalorder %s240_s12, %s1525_s18  ;;  %p1533_p2 = scmp.lt.s32.totalorder %s240_s12, %s240_s12 }
  0x24   : > { %p1534_p6 = scmp.lt.s32.totalorder %s1525_s18, %s1525_s18 }
  0x25   : > { %p1528_p13 = pnand %p1526_p1, %p1490_p12 }
  0x26   : > { %p1535_p5 = por %p1534_p6, %p1533_p2 }
  0x27   : > { %p1529_p0 = pneg %p1528_p13 }
  0x28   : > { %1299 = dma.hbm_to_vmem [thread:$0]  (!%p1796_p11), %s1995_s2, 6144, %s224_s9, [#allocation6], %s1692_s14, %s1692_s14, %s1693_s15  }
  0x29   : > { %p1536_p10 = pnand %p1535_p5, %p1529_p0 }
  0x2b   : > { %1539 = shalt.err (!%p1536_p10)
}
  0x2c   : > { %s1996_s4 = sld [smem:[#allocation22_spill]]  ;;  %s38_s28 = sadd.s32 1, %s1684_s25 }
  0x2d   : > { %s47_s8 = sadd.s32 1, %s1676_s23  ;;  %p40_p1 = scmp.ge.s32.totalorder %s38_s28, 2 }
  0x2e   : > { %p54_p2 = scmp.ne.s32.totalorder %s1676_s23, %s1672_s22  ;;  %p55_p6 = scmp.eq.s32.totalorder %s1688_s26, 0 }
  0x2f   : > { %p1316_p12 = scmp.lt.s32.totalorder %s1688_s26, 2  ;;  %s2019_s28 = smov (%p40_p1, %s38_s28), 0 }
  0x30   : > { %1997 = sst [smem:[#allocation18_spill]] %s2019_s28  ;;  %p56_p3 = por %p55_p6, %p54_p2 }
  0x31   : > { %p1998_p7 = scmp.eq.s32.totalorder %s1768_s27, 1  ;;  %s42_s10 = ssub.s32 %s1684_s25, %s2019_s28 }
  0x32   : > { %1302 = dma.hbm_to_vmem [thread:$0]  (!%p1796_p11), %s1996_s4, 2048, %s240_s12, [#allocation9], %s1692_s14, %s1692_s14, %s1693_s15  }
  0x33   : > { %p1828_p9 = por %p1998_p7, %p54_p2  ;;  %s256_s11 = sand.u32 1, %s1676_s23  }
  0x34   : > { %p45_p11 = scmp.eq.s32.totalorder %s42_s10, 0  ;;  %s1835_s12 = sshll.u32 %s256_s11, 3 }
  0x35   : > { %s1982_s13 = sshll.u32 %s1684_s25, 7  ;;  %s2001_s0 = sld [smem:[#allocation20_spill]] }
  0x36   : > { %s1839_s14 = scalar_select %p45_p11, %s1676_s23, %s47_s8  }
  0x37   : > { %s260_s18 = scalar_lea.vmem [#allocation2], %s1835_s12  ;;  %p1849_p13 = pnand %p1316_p12, %p56_p3 }
  0x38   : > { %2000 = sst [smem:[#allocation19_spill]] %s1839_s14  ;;  %s269_s19 = sshll.u32 %s260_s18, 4  ;;  %s270_s19 = int_to_ptr.vmem [resolvable:$true] %s269_s19 }
  0x39   : > { %s257_s10 = scalar_lea.sflag [#allocation3], %s256_s11  ;;  %p1542_p0 = pneg %p1849_p13 }
  0x3a   : > { %s1553_s8 = scalar_lea.vmem %s270_s19, 128  ;;  %s1694_s15 = smov [#allocation2]  }
  0x3b   : > { %s268_s17 = scalar_lea.hbm %s2001_s0, %s1982_s13  ;;  %p1554_p5 = scmp.ne.s32.totalorder %s270_s19, %s1553_s8 }
  0x3c   : > { %s1558_s16 = sshll.u32 %s1694_s15, 4  ;;  %s1559_s16 = int_to_ptr.vmem [resolvable:$false] %s1558_s16 }
  0x3d   : > { %p1556_p10 = pnand %p1554_p5, %p1542_p0  ;;  %s1560_s18 = scalar_lea.vmem %s1559_s16, 256 }
  0x3e   : > { %p1561_p2 = scmp.lt.s32.totalorder %s270_s19, %s1559_s16  ;;  %p1562_p6 = scmp.lt.s32.totalorder %s1560_s18, %s1553_s8 }
  0x3f   : > { %p1557_p1 = pneg %p1556_p10 }
  0x40   : > { %p1563_p12 = por %p1562_p6, %p1561_p2 }
  0x42   : > { %p1564_p3 = pnand %p1563_p12, %p1557_p1 }
  0x44   : > { %1567 = shalt.err (!%p1564_p3)
}
  0x45   : > { %s1695_s13 = smov 64   ;;  %s1696_s11 = smov 4  }
  0x46   : > { %1306 = dma.hbm_to_vmem [thread:$0]  (!%p1849_p13), %s268_s17, 128, %s270_s19, %s257_s10, %s1695_s13, %s1695_s13, %s1696_s11  }
  0x47   : > { %s2003_s0 = sshll.u32 %s1684_s25, 7  ;;  %s283_s28 = scalar_lea.vmem [#allocation5], %s1835_s12 }
  0x48   : > { %s291_s15 = scalar_lea.hbm %s1975_s1, %s2003_s0  ;;  %s292_s16 = sshll.u32 %s283_s28, 4  ;;  %s293_s16 = int_to_ptr.vmem [resolvable:$true] %s292_s16 }
  0x49   : > { %s279_s8 = sand.u32 1, %s1688_s26   ;;  %s1581_s14 = scalar_lea.vmem %s293_s16, 128 }
  0x4a   : > { %s280_s18 = scalar_lea.sflag [#allocation6], %s279_s8  ;;  %p1582_p7 = scmp.ne.s32.totalorder %s293_s16, %s1581_s14 }
  0x4b   : > { %s1697_s23 = smov [#allocation5]  }
  0x4c   : > { %p1584_p11 = pnand %p1582_p7, %p1542_p0  ;;  %s1586_s30 = sshll.u32 %s1697_s23, 4  ;;  %s1587_s30 = int_to_ptr.vmem [resolvable:$false] %s1586_s30 }
  0x4d   : > { %s1588_s17 = scalar_lea.vmem %s1587_s30, 256  ;;  %p1589_p10 = scmp.lt.s32.totalorder %s293_s16, %s1587_s30 }
  0x4e   : > { %p1585_p5 = pneg %p1584_p11  ;;  %p1590_p1 = scmp.lt.s32.totalorder %s1588_s17, %s1581_s14 }
  0x50   : > { %p1591_p2 = por %p1590_p1, %p1589_p10 }
  0x52   : > { %p1592_p6 = pnand %p1591_p2, %p1585_p5 }
  0x54   : > { %1595 = shalt.err (!%p1592_p6)
}
  0x55   : > { %1309 = dma.hbm_to_vmem [thread:$0]  (!%p1849_p13), %s291_s15, 128, %s293_s16, %s280_s18, %s1695_s13, %s1695_s13, %s1696_s11  }
  0x56   : > { %304 = sbr.rel (%p1787_p8) target bundleno = 623 (0x26f), region = 44  ;;  %s1875_s0 = sand.u32 (!%p1787_p8), 1, %s1672_s22  }
  0x57   : > { %s1182_s2 = sshll.u32 (!%p1787_p8), %s1875_s0, 3  ;;  %s307_s4 = scalar_lea.sflag (!%p1787_p8), [#allocation3], %s1875_s0 }
  0x58   : > { %s1879_s23 = scalar_lea.vmem (!%p1787_p8), [#allocation2], %s1182_s2 }
  0x5b   : > { %1647 = dma.done.wait (%p1777_p4), %s307_s4, 128  }
  0x5c   : > { %1649 = vsyncadd (%p1777_p4), %s307_s4, 4294967168  ;;  %s315_s30 = sand.u32 1, %s1768_s27   ;;  %s1886_s28 = scalar_lea.vmem [#allocation5], %s1182_s2 }
  0x5d   : > { %s316_s7 = scalar_lea.sflag [#allocation6], %s315_s30 }
  0x5e   : > { %1651 = dma.done.wait (%p1777_p4), %s316_s7, 128  }
  0x5f   : > { %1653 = vsyncadd (%p1777_p4), %s316_s7, 4294967168  ;;  %p2004_p8 = scmp.eq.s32.totalorder %s1768_s27, 0 }
  0x61   : > { %1655 = dma.done.wait (%p2004_p8), [#allocation6], 6144   ;;  %p2005_p13 = pmov %p2004_p8 }
  0x62   : > { %p2006_p0 = pmov %p2004_p8 }
  0x63   : > { %1657 = vsyncadd (%p2005_p13), [#allocation6], 4294961152 }
  0x64   : > { %1659 = dma.done.wait (%p2006_p0), [#allocation9], 2048   ;;  %p2007_p12 = pmov %p2006_p0 }
  0x65   : > { %v1698_v0 = vmov 0   ;;  %v1377_v1 = vld [vmem:[#allocation7 + $0xf4] ss:$8 sps:$4 sm:$0xff]   ;;  %v1381_v3 = vld [vmem:[#allocation7 + $0xf0] ss:$8 sps:$4 sm:$0xff]   ;;  %v1903_v27 = vld [vmem:[%s1879_s23] sm:$0xff]  }
  0x66   : > { %1661 = vsyncadd (%p2007_p12), [#allocation9], 4294965248  ;;  %529 = vmatprep.mubr.bf16.mxu0 %v1698_v0  ;;  %657 = vmatprep.mubr.bf16.mxu1 %v1698_v0  ;;  %v1379_v2 = vld [vmem:[#allocation7 + $0x74] ss:$8 sps:$4 sm:$0xff]   ;;  %v1382_v4 = vld [vmem:[#allocation7 + $0x70] ss:$8 sps:$4 sm:$0xff]  }
  0x67   : > { %497 = vmatprep.subr.bf16.mxu0 %v1377_v1  ;;  %625 = vmatprep.subr.bf16.mxu1 %v1379_v2  ;;  %v1383_v5 = vld [vmem:[#allocation7 + $0xe4] ss:$8 sps:$4 sm:$0xff]   ;;  %v1387_v7 = vld [vmem:[#allocation7 + $0xe0] ss:$8 sps:$4 sm:$0xff]   ;;  %v1389_v9 = vld [vmem:[#allocation7 + $0xd4] ss:$8 sps:$4 sm:$0xff]  }
  0x68   : > { %498 = vmatpush1.bf16.msra.mxu0 %v1381_v3  ;;  %626 = vmatpush1.bf16.msra.mxu1 %v1382_v4  ;;  %v1385_v6 = vld [vmem:[#allocation7 + $0x64] ss:$8 sps:$4 sm:$0xff]   ;;  %v1388_v8 = vld [vmem:[#allocation7 + $0x60] ss:$8 sps:$4 sm:$0xff]   ;;  %v1391_v10 = vld [vmem:[#allocation7 + $0x54] ss:$8 sps:$4 sm:$0xff]  }
  0x69   : > { %499 = vmatprep.subr.bf16.mxu0 %v1383_v5  ;;  %627 = vmatprep.subr.bf16.mxu1 %v1385_v6  ;;  %v1393_v11 = vld [vmem:[#allocation7 + $0xd0] ss:$8 sps:$4 sm:$0xff]   ;;  %v1395_v13 = vld [vmem:[#allocation7 + $0xc4] ss:$8 sps:$4 sm:$0xff]   ;;  %v1399_v15 = vld [vmem:[#allocation7 + $0xc0] ss:$8 sps:$4 sm:$0xff]  }
  0x6a   : > { %v1394_v12 = vld [vmem:[#allocation7 + $0x50] ss:$8 sps:$4 sm:$0xff]   ;;  %v1397_v14 = vld [vmem:[#allocation7 + $0x44] ss:$8 sps:$4 sm:$0xff]   ;;  %v1400_v16 = vld [vmem:[#allocation7 + $0x40] ss:$8 sps:$4 sm:$0xff]  }
  0x6b   : > { %v1401_v17 = vld [vmem:[#allocation7 + $0xb4] ss:$8 sps:$4 sm:$0xff]   ;;  %v1405_v19 = vld [vmem:[#allocation7 + $0xb0] ss:$8 sps:$4 sm:$0xff]   ;;  %v1407_v21 = vld [vmem:[#allocation7 + $0xa4] ss:$8 sps:$4 sm:$0xff]  }
  0x6c   : > { %500 = vmatpush1.bf16.msra.mxu0 %v1387_v7  ;;  %628 = vmatpush1.bf16.msra.mxu1 %v1388_v8  ;;  %v1403_v18 = vld [vmem:[#allocation7 + $0x34] ss:$8 sps:$4 sm:$0xff]   ;;  %v1406_v20 = vld [vmem:[#allocation7 + $0x30] ss:$8 sps:$4 sm:$0xff]   ;;  %v1409_v22 = vld [vmem:[#allocation7 + $0x24] ss:$8 sps:$4 sm:$0xff]  }
  0x6d   : > { %501 = vmatprep.subr.bf16.mxu0 %v1389_v9  ;;  %629 = vmatprep.subr.bf16.mxu1 %v1391_v10  ;;  %v1411_v23 = vld [vmem:[#allocation7 + $0xa0] ss:$8 sps:$4 sm:$0xff]   ;;  %v1413_v25 = vld [vmem:[#allocation7 + $0x94] ss:$8 sps:$4 sm:$0xff]   ;;  %v1417_v28 = vld [vmem:[#allocation7 + $0x90] ss:$8 sps:$4 sm:$0xff]  }
  0x6e   : > { %v1412_v24 = vld [vmem:[#allocation7 + $0x20] ss:$8 sps:$4 sm:$0xff]   ;;  %v1415_v26 = vld [vmem:[#allocation7 + $0x14] ss:$8 sps:$4 sm:$0xff]   ;;  %v1418_v29 = vld [vmem:[#allocation7 + $0x10] ss:$8 sps:$4 sm:$0xff]  }
  0x6f   : > { %v1425_v30 = vld [vmem:[%s1886_s28] sm:$0xff]   ;;  %v1419_v31 = vld [vmem:[#allocation7 + $0x84] ss:$8 sps:$4 sm:$0xff]   ;;  %v1423_v33 = vld [vmem:[#allocation7 + $0x80] ss:$8 sps:$4 sm:$0xff]   ;;  %v414_v36 = vrot.slane %v1903_v27, 7 }
  0x70   : > { %502 = vmatpush1.bf16.msra.mxu0 %v1393_v11  ;;  %630 = vmatpush1.bf16.msra.mxu1 %v1394_v12  ;;  %v1421_v32 = vld [vmem:[#allocation7 + $0x4] ss:$8 sps:$4 sm:$0xff]   ;;  %v1424_v34 = vld [vmem:[#allocation7] ss:$8 sps:$4 sm:$0xff]   ;;  %v413_v35 = vrot.slane %v1425_v30, 7  ;;  %v541_v37 = vrot.slane %v1425_v30, 6  ;;  %v814_v12 = vlaneseq }
  0x71   : > { %503 = vmatprep.subr.bf16.mxu0 %v1395_v13  ;;  %631 = vmatprep.subr.bf16.mxu1 %v1397_v14  ;;  %v542_v38 = vrot.slane %v1903_v27, 6  ;;  %vm412_vm0 = vcmask 1040384   ;;  %vm540_vm1 = vcmask 1041408   ;;  %v1429_v39 = vld [vmem:[#allocation7 + $0x174] ss:$8 sps:$4 sm:$0xff]   ;;  %s1186_s14 = sshll.u32 %s1875_s0, 4 }
  0x72   : > { %v415_v40 = vsel %vm412_vm0, %v413_v35, %v414_v36  ;;  %v1427_v42 = vld [vmem:[#allocation7 + $0x170] ss:$8 sps:$4 sm:$0xff]   ;;  %v1432_v43 = vld [vmem:[#allocation7 + $0x164] ss:$8 sps:$4 sm:$0xff]   ;;  %v1430_v44 = vld [vmem:[#allocation7 + $0x160] ss:$8 sps:$4 sm:$0xff]  }
  0x73   : > { %v543_v41 = vsel %vm540_vm1, %v541_v37, %v542_v38  ;;  %v1435_v45 = vld [vmem:[#allocation7 + $0x154] ss:$8 sps:$4 sm:$0xff]   ;;  %v1433_v46 = vld [vmem:[#allocation7 + $0x150] ss:$8 sps:$4 sm:$0xff]   ;;  %v1438_v47 = vld [vmem:[#allocation7 + $0x144] ss:$8 sps:$4 sm:$0xff]  }
  0x74   : > { %504 = vmatpush1.bf16.msra.mxu0 %v1399_v15  ;;  %632 = vmatpush1.bf16.msra.mxu1 %v1400_v16  ;;  %v1436_v48 = vld [vmem:[#allocation7 + $0x140] ss:$8 sps:$4 sm:$0xff]   ;;  %v1441_v49 = vld [vmem:[#allocation7 + $0x134] ss:$8 sps:$4 sm:$0xff]   ;;  %v1439_v50 = vld [vmem:[#allocation7 + $0x130] ss:$8 sps:$4 sm:$0xff]  }
  0x75   : > { %505 = vmatprep.subr.bf16.mxu0 %v1401_v17  ;;  %633 = vmatprep.subr.bf16.mxu1 %v1403_v18  ;;  %v1444_v51 = vld [vmem:[#allocation7 + $0x124] ss:$8 sps:$4 sm:$0xff]   ;;  %v1442_v52 = vld [vmem:[#allocation7 + $0x120] ss:$8 sps:$4 sm:$0xff]   ;;  %v1447_v53 = vld [vmem:[#allocation7 + $0x114] ss:$8 sps:$4 sm:$0xff]  }
  0x76   : > { %v1445_v54 = vld [vmem:[#allocation7 + $0x110] ss:$8 sps:$4 sm:$0xff]   ;;  %v1450_v55 = vld [vmem:[#allocation7 + $0x104] ss:$8 sps:$4 sm:$0xff]   ;;  %v1448_v56 = vld [vmem:[#allocation7 + $0x100] ss:$8 sps:$4 sm:$0xff]  }
  0x77   : > { %v1453_v57 = vld [vmem:[#allocation8 + $0x74] ss:$8 sps:$4 sm:$0xff]   ;;  %v1451_v58 = vld [vmem:[#allocation8 + $0x70] ss:$8 sps:$4 sm:$0xff]   ;;  %v1456_v59 = vld [vmem:[#allocation8 + $0x64] ss:$8 sps:$4 sm:$0xff]  }
  0x78   : > { %506 = vmatpush1.bf16.msra.mxu0 %v1405_v19  ;;  %634 = vmatpush1.bf16.msra.mxu1 %v1406_v20  ;;  %v1454_v60 = vld [vmem:[#allocation8 + $0x60] ss:$8 sps:$4 sm:$0xff]   ;;  %v1459_v61 = vld [vmem:[#allocation8 + $0x54] ss:$8 sps:$4 sm:$0xff]   ;;  %v1457_v62 = vld [vmem:[#allocation8 + $0x50] ss:$8 sps:$4 sm:$0xff]  }
  0x79   : > { %507 = vmatprep.subr.bf16.mxu0 %v1407_v21  ;;  %635 = vmatprep.subr.bf16.mxu1 %v1409_v22  ;;  %v1462_v63 = vld [vmem:[#allocation8 + $0x44] ss:$8 sps:$4 sm:$0xff]   ;;  %v1463_v1 = vld [vmem:[#allocation8 + $0x30] ss:$8 sps:$4 sm:$0xff]   ;;  %v1465_v2 = vld [vmem:[#allocation8 + $0x34] ss:$8 sps:$4 sm:$0xff]  }
  0x7a   : > { %v1468_v3 = vld [vmem:[#allocation8 + $0x24] ss:$8 sps:$4 sm:$0xff]   ;;  %v1466_v4 = vld [vmem:[#allocation8 + $0x20] ss:$8 sps:$4 sm:$0xff]   ;;  %v1471_v5 = vld [vmem:[#allocation8 + $0x14] ss:$8 sps:$4 sm:$0xff]  }
  0x7b   : > { %v1469_v6 = vld [vmem:[#allocation8 + $0x10] ss:$8 sps:$4 sm:$0xff]   ;;  %v1474_v7 = vld [vmem:[#allocation8 + $0x4] ss:$8 sps:$4 sm:$0xff]   ;;  %v1472_v8 = vld [vmem:[#allocation8] ss:$8 sps:$4 sm:$0xff]  }
  0x7c   : > { %508 = vmatpush1.bf16.msra.mxu0 %v1411_v23  ;;  %636 = vmatpush1.bf16.msra.mxu1 %v1412_v24  ;;  %v815_v15 = vshrl.u32 %v814_v12, 7  ;;  %v812_v20 = vld [vmem:[%s1977_s3] sm:$0x3]  ;;  %s360_s19 = scalar_lea.vmem [#allocation10], %s1186_s14  ;;  %s1270_s10 = sshll.u32 %s1680_s24, 8 }
  0x7d   : > { %509 = vmatprep.subr.bf16.mxu0 %v1413_v25  ;;  %637 = vmatprep.subr.bf16.mxu1 %v1415_v26  ;;  %s1037_s20 = sshll.u32 %s360_s19, 4  ;;  %s1926_s16 = scalar_lea.hbm %s1980_s6, %s1270_s10  ;;  %s1921_s20 = int_to_ptr.vmem [resolvable:$true] %s1037_s20 }
  0x7e   : > { %v820_v16 = vsub.s32 1, %v815_v15  ;;  %v816_v35 = vsub.s32 0, %v815_v15  ;;  %s1021_s8 = scalar_lea.sflag [#allocation4], %s1875_s0  ;;  %s1596_s18 = scalar_lea.vmem %s1921_s20, 256 }
  0x7f   : > { %p1597_p4 = scmp.ne.s32.totalorder %s1921_s20, %s1596_s18  ;;  %s1699_s24 = smov [#allocation10]  }
  0x80   : > { %510 = vmatpush1.bf16.msra.mxu0 %v1417_v28  ;;  %638 = vmatpush1.bf16.msra.mxu1 %v1418_v29  ;;  %v821_v22 = vrot.slane %v812_v20, %v820_v16  ;;  %s1600_s17 = sshll.u32 %s1699_s24, 4  ;;  %s1601_s17 = int_to_ptr.vmem [resolvable:$false] %s1600_s17 }
  0x81   : > { %511 = vmatprep.subr.bf16.mxu0 %v1419_v31  ;;  %639 = vmatprep.subr.bf16.mxu1 %v1421_v32  ;;  %p1598_p3 = pnand %p1597_p4, %p1828_p9  ;;  %s1602_s2 = scalar_lea.vmem %s1601_s17, 512 }
  0x82   : > { %p1603_p11 = scmp.lt.s32.totalorder %s1921_s20, %s1601_s17  ;;  %p1604_p5 = scmp.lt.s32.totalorder %s1602_s2, %s1596_s18 }
  0x83   : > { %p1599_p7 = pneg %p1598_p3 }
  0x84   : > { %512 = vmatpush1.bf16.msra.mxu0 %v1423_v33  ;;  %640 = vmatpush1.bf16.msra.mxu1 %v1424_v34  ;;  %p1605_p10 = por %p1604_p5, %p1603_p11 }
  0x85   : > { %765 = vmatprep.subr.bf16.mxu0 %v1429_v39  ;;  %953 = vmatprep.subr.bf16.mxu1 %v1453_v57  ;;  %v817_v39 = vrot.slane %v812_v20, %v816_v35 }
  0x86   : > { %p1606_p1 = pnand %p1605_p10, %p1599_p7 }
  0x87   : > { %530 = vmatmul.mubr.bf16.vlgmr.msra.gmra.mxu0 %v415_v40  ;;  %658 = vmatmul.mubr.bf16.vlgmr.msra.gmra.mxu1 %v543_v41 }
  0x88   : > { %766 = vmatpush1.bf16.msra.mxu0 %v1427_v42  ;;  %797 = vmatprep.mubr.bf16.mxu0 %v1698_v0 }
  0x89   : > { %767 = vmatprep.subr.bf16.mxu0 %v1432_v43  ;;  %985 = vmatprep.mubr.bf16.mxu1 %v1698_v0  ;;  %v1460_v0 = vld [vmem:[#allocation8 + $0x40] ss:$8 sps:$4 sm:$0xff]  }
  0x8a   : > { %954 = vmatpush1.bf16.msra.mxu1 %v1451_v58 }
  0x8b   : > { %955 = vmatprep.subr.bf16.mxu1 %v1456_v59 }
  0x8c   : > { %768 = vmatpush1.bf16.msra.mxu0 %v1430_v44 }
  0x8d   : > { %769 = vmatprep.subr.bf16.mxu0 %v1435_v45 }
  0x8e   : > { %956 = vmatpush1.bf16.msra.mxu1 %v1454_v60 }
  0x8f   : > { %957 = vmatprep.subr.bf16.mxu1 %v1459_v61 }
  0x90   : > { %770 = vmatpush1.bf16.msra.mxu0 %v1433_v46 }
  0x91   : > { %771 = vmatprep.subr.bf16.mxu0 %v1438_v47 }
  0x92   : > { %958 = vmatpush1.bf16.msra.mxu1 %v1457_v62 }
  0x93   : > { %959 = vmatprep.subr.bf16.mxu1 %v1462_v63  ;;  %v997_v63 = vunpack.c.h.bf16 %v1903_v27 }
  0x94   : > { %772 = vmatpush1.bf16.msra.mxu0 %v1436_v48 }
  0x95   : > { %773 = vmatprep.subr.bf16.mxu0 %v1441_v49 }
  0x96   : > { %960 = vmatpush1.bf16.msra.mxu1 %v1460_v0 }
  0x97   : > { %961 = vmatprep.subr.bf16.mxu1 %v1465_v2 }
  0x98   : > { %774 = vmatpush1.bf16.msra.mxu0 %v1439_v50 }
  0x99   : > { %775 = vmatprep.subr.bf16.mxu0 %v1444_v51 }
  0x9a   : > { %962 = vmatpush1.bf16.msra.mxu1 %v1463_v1 }
  0x9b   : > { %963 = vmatprep.subr.bf16.mxu1 %v1468_v3 }
  0x9c   : > { %776 = vmatpush1.bf16.msra.mxu0 %v1442_v52 }
  0x9d   : > { %777 = vmatprep.subr.bf16.mxu0 %v1447_v53 }
  0x9e   : > { %964 = vmatpush1.bf16.msra.mxu1 %v1466_v4 }
  0x9f   : > { %965 = vmatprep.subr.bf16.mxu1 %v1471_v5 }
  0xa0   : > { %778 = vmatpush1.bf16.msra.mxu0 %v1445_v54  ;;  %v861_v54 = vld [vmem:[%s1979_s5] sm:$0x3] }
  0xa1   : > { %779 = vmatprep.subr.bf16.mxu0 %v1450_v55  ;;  %v866_v55 = vrot.slane %v861_v54, %v816_v35  ;;  %v870_v57 = vrot.slane %v861_v54, %v820_v16 }
  0xa2   : > { %966 = vmatpush1.bf16.msra.mxu1 %v1469_v6 }
  0xa3   : > { %967 = vmatprep.subr.bf16.mxu1 %v1474_v7 }
  0xa4   : > { %780 = vmatpush1.bf16.msra.mxu0 %v1448_v56  ;;  %v996_v56 = vunpack.c.l.bf16 %v1903_v27 }
  0xa6   : > { %968 = vmatpush1.bf16.msra.mxu1 %v1472_v8 }
  0xa7   : > { %798 = vmatmul.mubr.bf16.vlgmr.msra.gmra.mxu0 %v1903_v27 }
 0x147   : > { %v531_v9 = vpop.f32.mrf.mxu0  ;;  %v659_v10 = vpop.f32.mrf.mxu1 }
 0x148   : > { %v660_v36 = vadd.f32 %v659_v10, %v531_v9 }
 0x149   : > { %v533_v11 = vpop.f32.mrf.mxu0  ;;  %v661_v13 = vpop.f32.mrf.mxu1 }
 0x14a   : > { %v662_v21 = vadd.f32 %v661_v13, %v533_v11 }
 0x14b   : > { %v535_v14 = vpop.f32.mrf.mxu0  ;;  %v663_v17 = vpop.f32.mrf.mxu1 }
 0x14c   : > { %v664_v37 = vadd.f32 %v663_v17, %v535_v14 }
 0x14d   : > { %v537_v18 = vpop.f32.mrf.mxu0  ;;  %v665_v23 = vpop.f32.mrf.mxu1 }
 0x14e   : > { %v666_v28 = vadd.f32 %v665_v23, %v537_v18 }
 0x167   : > { %v799_v19 = vpop.f32.mrf.mxu0 }
 0x168   : > { %v808_v38 = vadd.f32 %v799_v19, %v660_v36 }
 0x169   : > { %v801_v24 = vpop.f32.mrf.mxu0 }
 0x16a   : > { %v809_v25 = vadd.f32 %v801_v24, %v662_v21  ;;  %v824_v42 = vadd.f32 %v817_v39, %v808_v38 }
 0x16b   : > { %v803_v26 = vpop.f32.mrf.mxu0 }
 0x16c   : > { %v825_v29 = vadd.f32 %v821_v22, %v809_v25  ;;  %v810_v40 = vadd.f32 %v803_v26, %v664_v37 }
 0x16d   : > { %v805_v30 = vpop.f32.mrf.mxu0 }
 0x16e   : > { %v1237_v31 = vmul.f32 -1.442695, %v825_v29  ;;  %v811_v32 = vadd.f32 %v805_v30, %v666_v28  ;;  %v826_v44 = vadd.f32 %v817_v39, %v810_v40 }
 0x170   : > { %1476 = vpow2.f32 %v1237_v31  ;;  %v827_v33 = vadd.f32 %v821_v22, %v811_v32 }
 0x172   : > { %v1238_v34 = vmul.f32 -1.442695, %v827_v33 }
 0x174   : > { %1478 = vpow2.f32 %v1238_v34 }
 0x175   : > { %1480 = vtanh.f32 %v824_v42 }
 0x17d   : > { %v1477_v41 = vpop.eup %1476 }
 0x17e   : > { %v836_v43 = vadd.f32 1.0, %v1477_v41 }
 0x180   : > { %1482 = vrcp.f32 %v836_v43 }
 0x181   : > { %v1479_v45 = vpop.eup %1478  ;;  %1484 = vtanh.f32 %v826_v44 }
 0x182   : > { %v837_v46 = vadd.f32 1.0, %v1479_v45  ;;  %v1481_v47 = vpop.eup %1480 }
 0x184   : > { %1486 = vrcp.f32 %v837_v46 }
 0x18d   : > { %v1483_v48 = vpop.eup %1482 }
 0x18e   : > { %v1485_v49 = vpop.eup %1484  ;;  %v842_v51 = vmul.f32 %v1483_v48, %v1481_v47 }
 0x191   : > { %v1487_v50 = vpop.eup %1486 }
 0x192   : > { %v843_v52 = vmul.f32 %v1487_v50, %v1485_v49 }
 0x194   : > { %v844_v53 = vpack.c.bf16 %v843_v52, %v842_v51 }
 0x196   : > { %986 = vmatmul.mubr.bf16.vlgmr.msra.gmra.mxu1 %v844_v53 }
 0x256   : > { %v987_v58 = vpop.f32.mrf.mxu1 }
 0x257   : > { %v988_v59 = vadd.f32 %v987_v58, %v866_v55 }
 0x258   : > { %v989_v60 = vpop.f32.mrf.mxu1 }
 0x259   : > { %v998_v61 = vadd.f32 %v996_v56, %v988_v59  ;;  %v990_v62 = vadd.f32 %v989_v60, %v870_v57 }
 0x25a   : > { %v991_v0 = vpop.f32.mrf.mxu1 }
 0x25b   : > { %v1274_v1 = vpack.c.bf16 %v990_v62, %v998_v61  ;;  %v992_v2 = vadd.f32 %v991_v0, %v866_v55 }
 0x25c   : > { %v993_v3 = vpop.f32.mrf.mxu1 }
 0x25d   : > { %1275 = vst [vmem:[%s360_s19] sm:$0xff] %v1274_v1   ;;  %v999_v4 = vadd.f32 %v997_v63, %v992_v2  ;;  %v994_v5 = vadd.f32 %v993_v3, %v870_v57 }
 0x25f   : > { %v1279_v27 = vpack.c.bf16 %v994_v5, %v999_v4 }
 0x261   : > { %1281 = vst [vmem:[%s360_s19 + $0x8] sm:$0xff] %v1279_v27  }
 0x262   : > { %1609 = shalt.err (!%p1606_p1)
}
 0x263   : > { %s1610_s4 = scalar_lea.hbm %s1926_s16, 256  ;;  %s1614_s7 = scalar_lea.hbm %s1980_s6, 512 }
 0x264   : > { %p1611_p2 = scmp.ne.s32.totalorder %s1926_s16, %s1610_s4  ;;  %p1615_p13 = scmp.lt.s32.totalorder %s1926_s16, %s1980_s6 }
 0x265   : > { %p1616_p0 = scmp.lt.s32.totalorder %s1614_s7, %s1610_s4 }
 0x266   : > { %p1612_p6 = pnand %p1611_p2, %p1828_p9 }
 0x267   : > { %p1617_p12 = por %p1616_p0, %p1615_p13 }
 0x268   : > { %p1613_p8 = pneg %p1612_p6 }
 0x26a   : > { %p1618_p4 = pnand %p1617_p12, %p1613_p8 }
 0x26c   : > { %1621 = shalt.err (!%p1618_p4)
}
 0x26d   : > { %s1700_s29 = smov 128   ;;  %s1701_s12 = smov 8  }
 0x26e   : > { %1294 = dma.vmem_to_hbm [thread:$0]  (%p1828_p9), %s1921_s20, 256, %s1926_s16, %s1021_s8, %s1700_s29, %s1700_s29, %s1701_s12  }
 0x26f PF: > { %s2008_s13 = sld [smem:[#allocation17_spill]]  ;;  %s1052_s14 = sand.u32 1, %s1668_s21  }
 0x270   : > { %p2010_p7 = scmp.ge.s32.totalorder %s1688_s26, 2  ;;  %s1053_s19 = scalar_lea.sflag [#allocation4], %s1052_s14 }
 0x275   : > { %p2009_p3 = scmp.ne.s32.totalorder %s2008_s13, 0 }
 0x277   : > { %p1311_p11 = pnand %p2010_p7, %p2009_p3 }
 0x279   : > { %p1312_p5 = pneg %p1311_p11 }
 0x27b   : > { %1663 = dma.done.wait (%p1312_p5), %s1053_s19, 256  }
 0x27c   : > { %1665 = vsyncadd (%p1312_p5), %s1053_s19, 4294967040  ;;  %s26_s26 = sadd.s32 1, %s1688_s26   ;;  %s2011_s10 = sld [smem:[#allocation16_spill]] }
 0x27d   : > { %p23_p10 = scmp.ge.s32.totalorder %s26_s26, 4   ;;  %s2012_s23 = sld [smem:[#allocation19_spill]] }
 0x27e   : > { %s2013_s9 = sld [smem:[#allocation18_spill]]  ;;  %s2014_s21 = smov %s1672_s22 }
 0x27f   : > { %s2016_s24 = smov %s1684_s25 }
 0x280   :  { %25 = sbr.rel (!%p23_p10) target bundleno = 13 (0xd), region = 112 }
 0x282   : > { %s2015_s22 = smov %s2011_s10 }
 0x284   : > { %s2017_s25 = smov %s2013_s9 }
 0x285   :  { %1058 = vsyncpa [#allocation3], 1 }
 0x286   :  { %1060 = vsyncpa [#allocation3 + $0x1], 1 }
 0x287   :  { %1061 = vsyncpa [#allocation6], 1 }
 0x288   :  { %1063 = vsyncpa [#allocation6 + $0x1], 1 }
 0x289   :  { %1064 = vsyncpa [#allocation9], 1 }
 0x28a   :  { %1065 = vsyncpa [#allocation4], 1 }
 0x28b   :  { %1067 = vsyncpa [#allocation4 + $0x1], 1 }

</bundles_post_ra>
